<compile_context>
chip_gen: v7x
topology: tpu7x:2x2x1
jax: 0.10.0
libtpu: 0.0.40
codegen_flags: <defaults>
</compile_context>

<pallas_src>
import jax
import jax.numpy as jnp
import numpy as np
from jax.experimental import pallas as pl
from jax.experimental.pallas import tpu as pltpu


def _lse_kernel(cen_ref, nbr_ref, dst_ref, ftr_ref,
                wc_ref, wn_ref, wd_ref, b_ref, o_ref):
    """One (channels, tile) block.

    cen_ref: (3, T)   centre xyz (K-broadcast)
    nbr_ref: (3, T)   gathered neighbour xyz
    dst_ref: (1, T)   knn distance
    ftr_ref: (D, T)   point feature (K-broadcast)
    wc_ref : (D, 3)   W[:,0:3] + W[:,6:9]   (BN folded)
    wn_ref : (D, 3)   W[:,3:6] - W[:,6:9]   (BN folded)
    wd_ref : (D, 1)   W[:,9:10]             (BN folded)
    b_ref  : (D, 1)   folded conv+BN bias
    o_ref  : (2D, T)  [relu(conv+bn) ; feature passthrough]
    """
    # 1x1 conv over the folded 10-wide input, with the concat removed
    # algebraically (feedback item 3): two tiny (D,3)x(3,T) matmuls + FMAs.
    z = jnp.dot(wc_ref[...], cen_ref[...], preferred_element_type=jnp.float32)
    z = z + jnp.dot(wn_ref[...], nbr_ref[...],
                    preferred_element_type=jnp.float32)
    z = z + wd_ref[...] * dst_ref[...]      # (D,1)*(1,T) -> (D,T)
    z = z + b_ref[...]                      # folded bias
    d = wc_ref.shape[0]
    o_ref[:d, :] = jnp.maximum(z, 0.0).astype(o_ref.dtype)   # ReLU(conv+BN)
    o_ref[d:, :] = ftr_ref[...].astype(o_ref.dtype)          # concat(feat)


def _pick_lane_tile(nk, d_out, target_tile):
    """Largest lane tile that (a) is a multiple of 128 (or the full, small
    N*K extent), (b) divides the (minimally padded) N*K axis so no big pad
    pass is needed, and (c) keeps double-buffered blocks a few MB of VMEM."""
    bytes_per_col = 4 * (3 + 3 + 1 + 3 * d_out)           # inputs + output
    budget = max(128, min(target_tile, (4 * 1024 * 1024) // bytes_per_col))
    budget = (budget // 128) * 128

    nk_pad = nk if (nk % 128 == 0 or nk < 128) else pl.cdiv(nk, 128) * 128
    if nk_pad <= budget:
        return nk_pad, nk_pad
    tile = 128
    for cand in range(budget, 127, -128):
        if nk_pad % cand == 0:
            tile = cand
            break
    return nk_pad, tile


def local_spatial_encoding(feat, xyz, idx, dist, w_fold, b_fold,
                           *, target_tile=4096, out_dtype=jnp.float32):
    """feat: [B, d_out, N, 1], xyz: [B, N, 3], idx/dist: [B, N, K],
    w_fold: [d_out, 10] (conv weight with BN folded), b_fold: [d_out].
    Returns [B, 2*d_out, N, K] (NCHW, matching the PyTorch module).

    out_dtype=jnp.bfloat16 would halve output HBM traffic (feedback item 7)
    but rounds the feature passthrough; default f32 matches the reference."""
    B, D, N, _ = feat.shape
    K = idx.shape[-1]
    NK = N * K

    # ---- split the BN-folded conv weight (feedback item 3) ----------------
    wc = w_fold[:, 0:3] + w_fold[:, 6:9]        # multiplies centre xyz
    wn = w_fold[:, 3:6] - w_fold[:, 6:9]        # multiplies neighbour xyz
    wd = w_fold[:, 9:10]                        # multiplies dist
    bb = b_fold.reshape(D, 1)

    # ---- channel-major operands, K-minor (== NCHW flattened) --------------
    xyz_t = jnp.transpose(xyz, (0, 2, 1))                        # (B,3,N)
    idx_b = jnp.broadcast_to(idx.reshape(B, 1, NK), (B, 3, NK))
    nbr = jnp.take_along_axis(xyz_t, idx_b, axis=2)              # (B,3,NK)
    cen = jnp.broadcast_to(xyz_t[:, :, :, None],
                           (B, 3, N, K)).reshape(B, 3, NK)       # see NOTE(4)
    dst = dist.reshape(B, 1, NK).astype(jnp.float32)
    ftr = jnp.broadcast_to(feat, (B, D, N, K)).reshape(B, D, NK)  # see NOTE(4)

    nk_pad, tm = _pick_lane_tile(NK, D, target_tile)
    if nk_pad != NK:
        pw = ((0, 0), (0, 0), (0, nk_pad - NK))
        cen, nbr, dst, ftr = (jnp.pad(a, pw) for a in (cen, nbr, dst, ftr))

    grid = (B, nk_pad // tm)

    out = pl.pallas_call(
        _lse_kernel,
        out_shape=jax.ShapeDtypeStruct((B, 2 * D, nk_pad), out_dtype),
        grid_spec=pltpu.PrefetchScalarGridSpec(
            num_scalar_prefetch=0,
            grid=grid,
            in_specs=[
                pl.BlockSpec((None, 3, tm), lambda b, i: (b, 0, i)),  # centre
                pl.BlockSpec((None, 3, tm), lambda b, i: (b, 0, i)),  # nbr
                pl.BlockSpec((None, 1, tm), lambda b, i: (b, 0, i)),  # dist
                pl.BlockSpec((None, D, tm), lambda b, i: (b, 0, i)),  # feat
                pl.BlockSpec((D, 3), lambda b, i: (0, 0)),            # wc
                pl.BlockSpec((D, 3), lambda b, i: (0, 0)),            # wn
                pl.BlockSpec((D, 1), lambda b, i: (0, 0)),            # wd
                pl.BlockSpec((D, 1), lambda b, i: (0, 0)),            # bias
            ],
            out_specs=pl.BlockSpec((None, 2 * D, tm), lambda b, i: (b, 0, i)),
        ),
        compiler_params=pltpu.CompilerParams(
            dimension_semantics=("parallel", "parallel")),
    )(cen, nbr, dst, ftr, wc, wn, wd, bb)

    if nk_pad != NK:
        out = out[:, :, :NK]
    return out.reshape(B, 2 * D, N, K)          # free reshape, already NCHW


def make_params(d_out, key):
    """Deterministic Conv2d(10->d_out, 1x1) + BatchNorm2d(d_out) params,
    BN evaluated in inference mode and folded into the conv weight/bias."""
    k1, k2, k3, k4, k5, k6 = jax.random.split(key, 6)
    w = 0.1 * jax.random.normal(k1, (d_out, 10), jnp.float32)   # [C_out, C_in]
    b = 0.1 * jax.random.normal(k2, (d_out,), jnp.float32)
    gamma = 1.0 + 0.1 * jax.random.normal(k3, (d_out,), jnp.float32)
    beta = 0.1 * jax.random.normal(k4, (d_out,), jnp.float32)
    running_mean = 0.1 * jax.random.normal(k5, (d_out,), jnp.float32)
    running_var = 1.0 + 0.1 * jax.random.uniform(k6, (d_out,), jnp.float32)
    eps = 1e-5  # BatchNorm2d default
    a = gamma / jnp.sqrt(running_var + eps)
    w_fold = w * a[:, None]                     # [d_out, 10]
    b_fold = (b - running_mean) * a + beta      # [d_out]
    return w_fold, b_fold


def reference(feat, xyz, idx, dist, w_fold, b_fold):
    """Pure-JAX mirror of the PyTorch forward (NCHW), for verification."""
    B, D, N, _ = feat.shape
    K = idx.shape[-1]
    ext_xyz = jnp.broadcast_to(
        jnp.transpose(xyz, (0, 2, 1))[..., None], (B, 3, N, K))
    neighbour = jnp.transpose(
        xyz[jnp.arange(B)[:, None, None], idx, :], (0, 3, 1, 2))
    concat = jnp.concatenate(
        [ext_xyz, neighbour, ext_xyz - neighbour, dist[:, None, :, :]], axis=1)
    z = jnp.einsum('dc,bcnk->bdnk', w_fold, concat) \
        + b_fold[None, :, None, None]
    y = jnp.maximum(z, 0.0)
    feat_rep = jnp.broadcast_to(feat, (B, D, N, K))
    return jnp.concatenate([y, feat_rep], axis=1)


if __name__ == "__main__":
    B, N, K, d_out = 2, 16, 8, 8
    key = jax.random.PRNGKey(0)
    kf, kx, ki, kd, kp = jax.random.split(key, 5)

    feat = jax.random.normal(kf, (B, d_out, N, 1), jnp.float32)  # [B, d_in, N, 1]
    xyz = jax.random.normal(kx, (B, N, 3), jnp.float32)          # [B, N, 3]
    idx = jax.random.randint(ki, (B, N, K), 0, N, dtype=jnp.int32)
    dist = jax.random.uniform(kd, (B, N, K), dtype=jnp.float32)

    w_fold, b_fold = make_params(d_out, kp)

    out = jax.jit(local_spatial_encoding)(feat, xyz, idx, dist, w_fold, b_fold)
    out = jax.block_until_ready(out)

    assert out.shape == (B, 2 * d_out, N, K), out.shape
    ref = reference(feat, xyz, idx, dist, w_fold, b_fold)
    np.testing.assert_allclose(np.asarray(out), np.asarray(ref),
                               rtol=1e-5, atol=1e-5)
    print("KERNEL_OK")
</pallas_src>

<mosaic_0001>
module attributes {stable_mosaic.version = 11 : i64} {
  func.func @_lse_kernel(%arg0: i32, %arg1: i32, %arg2: memref<1x3x128xf32, #tpu.memory_space<vmem>>, %arg3: memref<1x3x128xf32, #tpu.memory_space<vmem>>, %arg4: memref<1x1x128xf32, #tpu.memory_space<vmem>>, %arg5: memref<1x8x128xf32, #tpu.memory_space<vmem>>, %arg6: memref<8x3xf32, #tpu.memory_space<vmem>>, %arg7: memref<8x3xf32, #tpu.memory_space<vmem>>, %arg8: memref<8x1xf32, #tpu.memory_space<vmem>>, %arg9: memref<8x1xf32, #tpu.memory_space<vmem>>, %arg10: memref<1x16x128xf32, #tpu.memory_space<vmem>>) attributes {dimension_semantics = [#tpu.dimension_semantics<parallel>, #tpu.dimension_semantics<parallel>], iteration_bounds = array<i64: 2, 1>, scalar_prefetch = 0 : i64, scratch_operands = 0 : i64, tpu.core_type = #tpu.core_type<tc>, window_params = [{transform_indices = @transform_0, window_bounds = array<i64: 1, 3, 128>}, {transform_indices = @transform_1, window_bounds = array<i64: 1, 3, 128>}, {transform_indices = @transform_2, window_bounds = array<i64: 1, 1, 128>}, {transform_indices = @transform_3, window_bounds = array<i64: 1, 8, 128>}, {pipeline_mode = #tpu.pipeline_mode<synchronous>, transform_indices = @transform_4, window_bounds = array<i64: 8, 3>}, {pipeline_mode = #tpu.pipeline_mode<synchronous>, transform_indices = @transform_5, window_bounds = array<i64: 8, 3>}, {pipeline_mode = #tpu.pipeline_mode<synchronous>, transform_indices = @transform_6, window_bounds = array<i64: 8, 1>}, {pipeline_mode = #tpu.pipeline_mode<synchronous>, transform_indices = @transform_7, window_bounds = array<i64: 8, 1>}, {transform_indices = @transform_8, window_bounds = array<i64: 1, 16, 128>}]} {
    %c0 = arith.constant 0 : index
    %c0_0 = arith.constant 0 : index
    %0 = vector.load %arg6[%c0, %c0_0] : memref<8x3xf32, #tpu.memory_space<vmem>>, vector<8x3xf32>
    %c0_1 = arith.constant 0 : index
    %c0_2 = arith.constant 0 : index
    %c0_3 = arith.constant 0 : index
    %1 = vector.load %arg2[%c0_1, %c0_2, %c0_3] : memref<1x3x128xf32, #tpu.memory_space<vmem>>, vector<1x3x128xf32>
    %2 = vector.shape_cast %1 : vector<1x3x128xf32> to vector<3x128xf32>
    %cst = arith.constant dense<0.000000e+00> : vector<8x128xf32>
    %3 = tpu.matmul %0, %2, %cst {dimension_numbers = #tpu.dot_dimension_numbers<[1], [0], [0], [1], [0, 0, 1, 1], [], []>} : vector<8x3xf32>, vector<3x128xf32>, vector<8x128xf32> -> vector<8x128xf32>
    %c0_4 = arith.constant 0 : index
    %c0_5 = arith.constant 0 : index
    %4 = vector.load %arg7[%c0_4, %c0_5] : memref<8x3xf32, #tpu.memory_space<vmem>>, vector<8x3xf32>
    %c0_6 = arith.constant 0 : index
    %c0_7 = arith.constant 0 : index
    %c0_8 = arith.constant 0 : index
    %5 = vector.load %arg3[%c0_6, %c0_7, %c0_8] : memref<1x3x128xf32, #tpu.memory_space<vmem>>, vector<1x3x128xf32>
    %6 = vector.shape_cast %5 : vector<1x3x128xf32> to vector<3x128xf32>
    %cst_9 = arith.constant dense<0.000000e+00> : vector<8x128xf32>
    %7 = tpu.matmul %4, %6, %cst_9 {dimension_numbers = #tpu.dot_dimension_numbers<[1], [0], [0], [1], [0, 0, 1, 1], [], []>} : vector<8x3xf32>, vector<3x128xf32>, vector<8x128xf32> -> vector<8x128xf32>
    %8 = arith.addf %3, %7 : vector<8x128xf32>
    %c0_10 = arith.constant 0 : index
    %c0_11 = arith.constant 0 : index
    %9 = vector.load %arg8[%c0_10, %c0_11] : memref<8x1xf32, #tpu.memory_space<vmem>>, vector<8x1xf32>
    %c0_12 = arith.constant 0 : index
    %c0_13 = arith.constant 0 : index
    %c0_14 = arith.constant 0 : index
    %10 = vector.load %arg4[%c0_12, %c0_13, %c0_14] : memref<1x1x128xf32, #tpu.memory_space<vmem>>, vector<1x1x128xf32>
    %11 = vector.shape_cast %10 : vector<1x1x128xf32> to vector<1x128xf32>
    %12 = vector.broadcast %9 : vector<8x1xf32> to vector<8x128xf32>
    %13 = vector.broadcast %11 : vector<1x128xf32> to vector<8x128xf32>
    %14 = arith.mulf %12, %13 : vector<8x128xf32>
    %15 = arith.addf %8, %14 : vector<8x128xf32>
    %c0_15 = arith.constant 0 : index
    %c0_16 = arith.constant 0 : index
    %16 = vector.load %arg9[%c0_15, %c0_16] : memref<8x1xf32, #tpu.memory_space<vmem>>, vector<8x1xf32>
    %17 = vector.broadcast %16 : vector<8x1xf32> to vector<8x128xf32>
    %18 = arith.addf %15, %17 : vector<8x128xf32>
    %cst_17 = arith.constant 0.000000e+00 : f32
    %19 = vector.broadcast %cst_17 : f32 to vector<8x128xf32>
    %20 = arith.maximumf %18, %19 : vector<8x128xf32>
    %c0_18 = arith.constant 0 : index
    %c0_19 = arith.constant 0 : index
    %c0_20 = arith.constant 0 : index
    %21 = vector.load %arg10[%c0_18, %c0_19, %c0_20] : memref<1x16x128xf32, #tpu.memory_space<vmem>>, vector<1x8x128xf32>
    %22 = vector.shape_cast %21 : vector<1x8x128xf32> to vector<8x128xf32>
    %23 = vector.shape_cast %20 : vector<8x128xf32> to vector<1x8x128xf32>
    tpu.vector_store %arg10[%c0_18, %c0_19, %c0_20], %23 {strides = array<i32>} : memref<1x16x128xf32, #tpu.memory_space<vmem>>, vector<1x8x128xf32>,
    %c0_21 = arith.constant 0 : index
    %c0_22 = arith.constant 0 : index
    %c0_23 = arith.constant 0 : index
    %24 = vector.load %arg5[%c0_21, %c0_22, %c0_23] : memref<1x8x128xf32, #tpu.memory_space<vmem>>, vector<1x8x128xf32>
    %25 = vector.shape_cast %24 : vector<1x8x128xf32> to vector<8x128xf32>
    %c0_24 = arith.constant 0 : index
    %c8 = arith.constant 8 : index
    %c0_25 = arith.constant 0 : index
    %26 = vector.load %arg10[%c0_24, %c8, %c0_25] : memref<1x16x128xf32, #tpu.memory_space<vmem>>, vector<1x8x128xf32>
    %27 = vector.shape_cast %26 : vector<1x8x128xf32> to vector<8x128xf32>
    %28 = vector.shape_cast %25 : vector<8x128xf32> to vector<1x8x128xf32>
    tpu.vector_store %arg10[%c0_24, %c8, %c0_25], %28 {strides = array<i32>} : memref<1x16x128xf32, #tpu.memory_space<vmem>>, vector<1x8x128xf32>,
    return
  }
  func.func @transform_0(%arg0: i32, %arg1: i32) -> (i32, i32, i32) {
    %c0_i32 = arith.constant 0 : i32
    %c0_i32_0 = arith.constant 0 : i32
    return %arg0, %c0_i32, %arg1 : i32, i32, i32
  }
  func.func @transform_1(%arg0: i32, %arg1: i32) -> (i32, i32, i32) {
    %c0_i32 = arith.constant 0 : i32
    %c0_i32_0 = arith.constant 0 : i32
    return %arg0, %c0_i32, %arg1 : i32, i32, i32
  }
  func.func @transform_2(%arg0: i32, %arg1: i32) -> (i32, i32, i32) {
    %c0_i32 = arith.constant 0 : i32
    %c0_i32_0 = arith.constant 0 : i32
    return %arg0, %c0_i32, %arg1 : i32, i32, i32
  }
  func.func @transform_3(%arg0: i32, %arg1: i32) -> (i32, i32, i32) {
    %c0_i32 = arith.constant 0 : i32
    %c0_i32_0 = arith.constant 0 : i32
    return %arg0, %c0_i32, %arg1 : i32, i32, i32
  }
  func.func @transform_4(%arg0: i32, %arg1: i32) -> (i32, i32) {
    %c0_i32 = arith.constant 0 : i32
    %c0_i32_0 = arith.constant 0 : i32
    %c0_i32_1 = arith.constant 0 : i32
    return %c0_i32, %c0_i32_0 : i32, i32
  }
  func.func @transform_5(%arg0: i32, %arg1: i32) -> (i32, i32) {
    %c0_i32 = arith.constant 0 : i32
    %c0_i32_0 = arith.constant 0 : i32
    %c0_i32_1 = arith.constant 0 : i32
    return %c0_i32, %c0_i32_0 : i32, i32
  }
  func.func @transform_6(%arg0: i32, %arg1: i32) -> (i32, i32) {
    %c0_i32 = arith.constant 0 : i32
    %c0_i32_0 = arith.constant 0 : i32
    %c0_i32_1 = arith.constant 0 : i32
    return %c0_i32, %c0_i32_0 : i32, i32
  }
  func.func @transform_7(%arg0: i32, %arg1: i32) -> (i32, i32) {
    %c0_i32 = arith.constant 0 : i32
    %c0_i32_0 = arith.constant 0 : i32
    %c0_i32_1 = arith.constant 0 : i32
    return %c0_i32, %c0_i32_0 : i32, i32
  }
  func.func @transform_8(%arg0: i32, %arg1: i32) -> (i32, i32, i32) {
    %c0_i32 = arith.constant 0 : i32
    %c0_i32_0 = arith.constant 0 : i32
    return %arg0, %c0_i32, %arg1 : i32, i32, i32
  }
}

</mosaic_0001>

<bundles_post_ra>
// kernel: local_spatial_encoding.1
= control target key start
LH: loop header
LB: loop body
LE: loop exit
PB: predicated region body
PF: predicated region fallthrough
CT: control target
= control target key end

     0   :  { %s853_s27 = smov 0   ;;  %s855_s28 = smov 0   ;;  %s913_s0 = inlined_call_operand.vmem [shape: f32[2,3,128], index: 0, kind: input, shape index: {}]   ;;  %s914_s1 = inlined_call_operand.vmem [shape: f32[2,3,128], index: 1, kind: input, shape index: {}]   ;;  %s915_s2 = inlined_call_operand.vmem [shape: f32[2,1,128], index: 2, kind: input, shape index: {}]   ;;  %s916_s3 = inlined_call_operand.vmem [shape: f32[2,8,128], index: 3, kind: input, shape index: {}]   ;;  %s917_s4 = inlined_call_operand.vmem [shape: f32[8,3], index: 4, kind: input, shape index: {}]   ;;  %s918_s5 = inlined_call_operand.vmem [shape: f32[8,3], index: 5, kind: input, shape index: {}]   ;;  %s919_s6 = inlined_call_operand.vmem [shape: f32[8,1], index: 6, kind: input, shape index: {}]   ;;  %s920_s7 = inlined_call_operand.vmem [shape: f32[8,1], index: 7, kind: input, shape index: {}]   ;;  %s921_s8 = inlined_call_operand.vmem [shape: f32[2,16,128], index: 8, kind: output, shape index: {}]  }
   0x1   :  { %s857_s29 = smov 0  }
   0x2 LB: > { %s30_s30 = sadd.s32 1, %s799_s28  ;;  %p725_p0 = scmp.ge.s32.totalorder %s803_s29, 1  ;;  %s803_s29 = sphi %s857_s29, %s18_s29   ;;  %s799_s28 = sphi %s855_s28, %s923_s28   ;;  %s795_s27 = sphi %s853_s27, %s922_s27  }
   0x3   : > { %p32_p1 = scmp.ge.s32.totalorder %s30_s30, 2  ;;  %p321_p2 = scmp.lt.s32.totalorder %s803_s29, 3 }
   0x5   : > { %s925_s30 = smov (%p32_p1, %s30_s30), 0  ;;  %p322_p3 = pnand %p725_p0, %p321_p2 }
   0x6   : > { %p380_p4 = scmp.lt.s32.totalorder (!%p322_p3), %s795_s27, 1  ;;  %v805_v0 = vmov (!%p322_p3), 0.0   ;;  %v573_v1 = vld [vmem:[%s919_s6] sm:$0xff] (!%p322_p3)  ;;  %vm806_vm0 = vmmov (!%p322_p3), 0   ;;  %v807_v2 = vmov (!%p322_p3), 0   ;;  %vm423_vm1 = vcmask (!%p322_p3), 1042432  }
   0x7   : > { %325 = sbr.rel (%p322_p3) target bundleno = 241 (0xf1), region = 52  ;;  %743 = vmatprep.subr.mxu0 (!%p322_p3), %v805_v0  ;;  %748 = vmatprep.subr.mxu1 (!%p322_p3), %v805_v0  ;;  %v417_v3 = vld [vmem:[%s918_s5] sm:$0xff] (!%p322_p3)  ;;  %vm419_vm2 = vcmask (!%p322_p3), 23552  }
   0x8   : > { %745 = vmatprep.mubr.msk.f32.mxu0 (!%p322_p3), %vm806_vm0, %v805_v0  ;;  %750 = vmatprep.mubr.msk.f32.mxu1 (!%p322_p3), %vm806_vm0, %v805_v0  ;;  %v415_v4 = vld [vmem:[%s917_s4] sm:$0xff] (!%p322_p3) }
   0x9   : > { %780 = vset.pattern.permute.xlu0 (!%p322_p3), %v807_v2  ;;  %v588_v7 = vld [vmem:[%s920_s7] sm:$0xff] (!%p322_p3) }
   0xa   : > { %577 = vperm.xlu0 (!%p322_p3), %780, %v573_v1  }
   0xe   : > { %s927_s27 = smov (!%p380_p4, %s795_s27), 1  ;;  %591 = vperm.xlu0 %780, %v588_v7  }
   0xf   : > { %s726_s11 = sshll.u32 %s927_s27, 2  ;;  %s728_s24 = sshll.u32 %s927_s27, 3 }
  0x10   : > { %s393_s14 = scalar_lea.vmem %s914_s1, %s726_s11  ;;  %s386_s17 = scalar_lea.vmem %s913_s0, %s726_s11 }
  0x11   : > { %v418_v5 = vld [vmem:[%s393_s14] sm:$0x7]  ;;  %s738_s25 = sshll.u32 %s927_s27, 4  ;;  %s406_s10 = scalar_lea.vmem %s916_s3, %s728_s24 }
  0x12   : > { %v416_v6 = vld [vmem:[%s386_s17] sm:$0x7]  ;;  %744 = vmatpush3.msk.msra.mxu0 %vm423_vm1, %v418_v5  ;;  %s414_s13 = scalar_lea.vmem %s921_s8, %s738_s25  ;;  %s399_s16 = scalar_lea.vmem %s915_s2, %s927_s27 }
  0x13   : > { %749 = vmatpush3.msk.msra.mxu1 %vm423_vm1, %v416_v6  ;;  %746 = vmatmul.mubr.msk.f32.vlgmr.msra.gmra.mrb[0].mxu0 %vm419_vm2, %v417_v3  ;;  %v597_v8 = vld [vmem:[%s406_s10] sm:$0xff] }
  0x14   : > { %751 = vmatmul.mubr.msk.f32.vlgmr.msra.gmra.mrb[0].mxu1 %vm419_vm2, %v415_v4  ;;  %598 = vst [vmem:[%s414_s13 + $0x8] sm:$0xff] %v597_v8  ;;  %v735_v9 = vld [vmem:[%s399_s16] ss:$0 sm:$0xff] }
  0x89   : > { %v578_v10 = vpop.permute.xlu0 %577 }
  0x8a   : > { %v586_v11 = vmul.f32 %v735_v9, %v578_v10 }
  0x8d   : > { %v592_v18 = vpop.permute.xlu0 %591 }
  0xe6   : > { %v493_v12 = vpop.f32.mrb[0].mxu0 }
  0xe7   : > { %v569_v13 = vpop.f32.mrb[0].mxu1  ;;  %v747_v15 = vpop.f32.mrb[1].mxu0 }
  0xe8   : > { %v570_v14 = vadd.f32 %v569_v13, %v493_v12  ;;  %v752_v16 = vpop.f32.mrb[1].mxu1 }
  0xea   : > { %v587_v17 = vadd.f32 %v586_v11, %v570_v14 }
  0xec   : > { %v594_v19 = vadd.f32 %v592_v18, %v587_v17 }
  0xee   : > { %v595_v20 = vmax.f32 %v594_v19, 0.0 }
  0xf0   : > { %596 = vst [vmem:[%s414_s13] sm:$0xff] %v595_v20 }
  0xf1 PF: > { %s18_s29 = sadd.s32 1, %s803_s29   ;;  %s922_s27 = smov %s799_s28 }
  0xf2   : > { %p15_p5 = scmp.ge.s32.totalorder %s18_s29, 4   ;;  %s923_s28 = smov %s925_s30 }
  0xf4   :  { %17 = sbr.rel (!%p15_p5) target bundleno = 2 (0x2), region = 91 }

</bundles_post_ra>
